<compile_context>
chip_gen: v7x
topology: tpu7x:2x2x1
jax: 0.10.0
libtpu: 0.0.40
codegen_flags: <defaults>
</compile_context>

<pallas_src>
import jax
import jax.numpy as jnp
from jax.experimental import pallas as pl
from jax.experimental.pallas import tpu as pltpu

LANE = 128
SUBLANE = 8


def _round_up(n, m):
    return ((n + m - 1) // m) * m


def _vmem_limit_bytes():
    cap = 128 * 1024 * 1024
    try:
        info = pltpu.get_tpu_info()
        cap = int(getattr(info, "vmem_capacity_bytes", cap) or cap)
    except Exception:
        pass
    # Leave headroom for compiler-internal scratch (v7x only has 64 MiB/TC).
    return max(32 * 1024 * 1024, min(cap - 16 * 1024 * 1024, 100 * 1024 * 1024))


# ---------- Pass 1: conv (im2col matmul) + per-split partial BN statistics ----------
def _conv_stats_kernel(p_ref, w_ref, y_ref, psum_ref, psq_ref, sum_acc, sq_acc):
    i = pl.program_id(1)

    @pl.when(i == 0)
    def _init():
        sum_acc[...] = jnp.zeros_like(sum_acc)
        sq_acc[...] = jnp.zeros_like(sq_acc)

    # MXU: bf16 x bf16 -> f32 accumulation.
    y = jnp.dot(p_ref[...], w_ref[...], preferred_element_type=jnp.float32)

    # Per-channel partial sums folded to 8 sublanes (pure VPU adds; the
    # (tm, Cp) -> (tm//8, 8, Cp) reshape is tile-layout free).  Padded rows are
    # all-zero so they contribute nothing to either accumulator.
    y3 = y.reshape(-1, SUBLANE, y.shape[-1])
    sum_acc[...] += jnp.sum(y3, axis=0)
    sq_acc[...] += jnp.sum(y3 * y3, axis=0)

    # bf16 writeback of the conv output AFTER the f32 statistics were taken.
    y_ref[...] = y.astype(y_ref.dtype)

    @pl.when(i == pl.num_programs(1) - 1)
    def _flush():
        psum_ref[...] = sum_acc[...]
        psq_ref[...] = sq_acc[...]


# ---------- Pass 2: normalize + LeakyReLU(0.2), independent M tiles ----------
def _bn_lrelu_kernel(y_ref, scale_ref, shift_ref, o_ref):
    z = y_ref[...].astype(jnp.float32) * scale_ref[...] + shift_ref[...]
    o_ref[...] = jnp.where(z >= 0, z, jnp.float32(0.2) * z)


def _cnn_block_impl(x, w, gamma, beta, *, stride, tm=512, eps=1e-5):
    """x: [N, Cin, H, W]; w: [Cout, Cin, kh, kw]; returns [N, Cout, Ho, Wo]."""
    N, C, H, W = x.shape
    Cout, Cin, kh, kw = w.shape
    assert C == Cin
    Ho = (H - kh) // stride + 1
    Wo = (W - kw) // stride + 1
    M = N * Ho * Wo
    K = Cin * kh * kw

    Kp = _round_up(K, LANE)
    Cp = _round_up(Cout, LANE)

    # Keep pass-1 VMEM in budget on v7x when the (Kp, Cp) weight tile is large.
    if Kp >= 4096:
        tm = min(tm, 256)
    # Row tile multiple of 16 (bf16 sublane packing).
    tm_eff = _round_up(min(tm, _round_up(M, 2 * SUBLANE)), 2 * SUBLANE)

    n_tiles = pl.cdiv(M, tm_eff)
    n_split = 2 if n_tiles >= 2 else 1            # feed both v7x TensorCores
    n_tiles = _round_up(n_tiles, n_split)
    Mp = n_tiles * tm_eff
    tiles_per_split = n_tiles // n_split

    # --- im2col in channels-last tap order (i, j, c); cast to bf16 BEFORE the
    # stack so the (M, K) intermediate costs 2 B/elem. Plain-JAX glue.
    # TODO(synk): fuse im2col into pass 1 with manual DMA of overlapping slabs.
    x_nhwc = jnp.transpose(x, (0, 2, 3, 1)).astype(jnp.bfloat16)   # [N, H, W, C]
    taps = []
    for i in range(kh):
        for j in range(kw):
            taps.append(
                x_nhwc[:, i:i + stride * (Ho - 1) + 1:stride,
                          j:j + stride * (Wo - 1) + 1:stride, :])
    p = jnp.stack(taps, axis=3).reshape(M, K)                      # [M, K] bf16
    p = jnp.pad(p, ((0, Mp - M), (0, Kp - K)))
    wm = jnp.transpose(w, (2, 3, 1, 0)).reshape(K, Cout)           # same (i,j,c) order
    wm = jnp.pad(wm.astype(jnp.bfloat16), ((0, Kp - K), (0, Cp - Cout)))
    g = jnp.pad(gamma.astype(jnp.float32), (0, Cp - Cout))         # (Cp,)
    b = jnp.pad(beta.astype(jnp.float32), (0, Cp - Cout))          # (Cp,)

    vmem_limit = _vmem_limit_bytes()

    # --- pass 1: tiled conv matmul (bf16 y) + per-split partial BN stats ---
    y, psum, psq = pl.pallas_call(
        _conv_stats_kernel,
        out_shape=(
            jax.ShapeDtypeStruct((Mp, Cp), jnp.bfloat16),           # pre-BN conv output
            jax.ShapeDtypeStruct((n_split, SUBLANE, Cp), jnp.float32),  # partial sums
            jax.ShapeDtypeStruct((n_split, SUBLANE, Cp), jnp.float32),  # partial sumsq
        ),
        grid=(n_split, tiles_per_split),
        in_specs=[
            pl.BlockSpec((tm_eff, Kp), lambda c, i: (c * tiles_per_split + i, 0)),
            pl.BlockSpec((Kp, Cp), lambda c, i: (0, 0)),
        ],
        out_specs=(
            pl.BlockSpec((tm_eff, Cp), lambda c, i: (c * tiles_per_split + i, 0)),
            pl.BlockSpec((None, SUBLANE, Cp), lambda c, i: (c, 0, 0)),
            pl.BlockSpec((None, SUBLANE, Cp), lambda c, i: (c, 0, 0)),
        ),
        scratch_shapes=[
            pltpu.VMEM((SUBLANE, Cp), jnp.float32),   # per-channel sum (8 sublanes)
            pltpu.VMEM((SUBLANE, Cp), jnp.float32),   # per-channel sum of squares
        ],
        compiler_params=pltpu.CompilerParams(
            dimension_semantics=("parallel", "arbitrary"),
            vmem_limit_bytes=vmem_limit,
        ),
    )(p, wm)

    # --- tiny global stats fold (plain JAX on (n_split, 8, Cp)): stays correct
    # because each split only produced partial sums; divide by the TRUE M. ---
    # TODO(synk): two-level / mean-shifted accumulation for very large M to
    # guard against E[x^2] - mean^2 cancellation.
    m_total = jnp.float32(M)
    mean = psum.sum(axis=(0, 1)) / m_total
    var = jnp.maximum(psq.sum(axis=(0, 1)) / m_total - mean * mean, 0.0)
    scale = g * jax.lax.rsqrt(var + jnp.float32(eps))
    shift = b - mean * scale
    scale = scale.reshape(1, Cp)
    shift = shift.reshape(1, Cp)

    # --- pass 2: y * scale + shift, LeakyReLU(0.2); fully parallel over M ---
    out = pl.pallas_call(
        _bn_lrelu_kernel,
        out_shape=jax.ShapeDtypeStruct((Mp, Cp), jnp.float32),
        grid=(n_tiles,),
        in_specs=[
            pl.BlockSpec((tm_eff, Cp), lambda i: (i, 0)),
            pl.BlockSpec((1, Cp), lambda i: (0, 0)),
            pl.BlockSpec((1, Cp), lambda i: (0, 0)),
        ],
        out_specs=pl.BlockSpec((tm_eff, Cp), lambda i: (i, 0)),
        compiler_params=pltpu.CompilerParams(
            dimension_semantics=("parallel",),
            vmem_limit_bytes=vmem_limit,
        ),
    )(y, scale, shift)

    # TODO(synk): when chaining blocks, keep bf16 NHWC (M, Cout) here and fold
    # the un-pad/transpose into the next layer's im2col; NCHW f32 only at the
    # model boundary (this standalone module boundary is NCHW).
    out = out[:M, :Cout].reshape(N, Ho, Wo, Cout)
    return jnp.transpose(out, (0, 3, 1, 2))


cnn_block = jax.jit(_cnn_block_impl, static_argnames=("stride", "tm", "eps"))


def reference(x, w, gamma, beta, stride, eps=1e-5):
    y = jax.lax.conv_general_dilated(
        x, w, (stride, stride), "VALID",
        dimension_numbers=("NCHW", "OIHW", "NCHW"))
    mean = y.mean(axis=(0, 2, 3), keepdims=True)
    var = ((y - mean) ** 2).mean(axis=(0, 2, 3), keepdims=True)
    z = (y - mean) * jax.lax.rsqrt(var + eps)
    z = z * gamma.reshape(1, -1, 1, 1) + beta.reshape(1, -1, 1, 1)
    return jnp.where(z >= 0, z, 0.2 * z)


if __name__ == "__main__":
    in_channels, out_channels, stride = 4, 8, 2
    key = jax.random.PRNGKey(0)
    kx, kw_, kg, kb = jax.random.split(key, 4)

    x = jax.random.normal(kx, (2, in_channels, 16, 16), dtype=jnp.float32)
    w = 0.02 * jax.random.normal(kw_, (out_channels, in_channels, 4, 4), dtype=jnp.float32)
    gamma = 1.0 + 0.1 * jax.random.normal(kg, (out_channels,), dtype=jnp.float32)
    beta = 0.1 * jax.random.normal(kb, (out_channels,), dtype=jnp.float32)

    # tm=64 exercises the 2-way split grid (cross-split BN stat combine for
    # M=98); default tm exercises the padded single-tile / single-split path.
    outs = [cnn_block(x, w, gamma, beta, stride=stride, tm=64),
            cnn_block(x, w, gamma, beta, stride=stride)]
    outs = [jax.block_until_ready(o) for o in outs]

    # Precision-matched reference: same bf16-rounded conv inputs, f32 math.
    # The kernel additionally stores the conv output y in bf16 (per perf
    # review), so tolerances account for one bf16 rounding of y amplified by
    # the BN scale (~1/std).
    x_bf = x.astype(jnp.bfloat16).astype(jnp.float32)
    w_bf = w.astype(jnp.bfloat16).astype(jnp.float32)
    ref_matched = reference(x_bf, w_bf, gamma, beta, stride)
    ref_f32 = reference(x, w, gamma, beta, stride)

    for out in outs:
        assert out.shape == ref_f32.shape == (2, out_channels, 7, 7), out.shape
        assert jnp.allclose(out, ref_matched, atol=3e-2, rtol=3e-2), \
            float(jnp.abs(out - ref_matched).max())
        assert jnp.allclose(out, ref_f32, atol=8e-2, rtol=8e-2), \
            float(jnp.abs(out - ref_f32).max())

    print("KERNEL_OK")
</pallas_src>

<mosaic_0001>
module attributes {stable_mosaic.version = 11 : i64} {
  func.func @_conv_stats_kernel(%arg0: i32, %arg1: i32, %arg2: memref<64x128xbf16, #tpu.memory_space<vmem>>, %arg3: memref<128x128xbf16, #tpu.memory_space<vmem>>, %arg4: memref<64x128xbf16, #tpu.memory_space<vmem>>, %arg5: memref<1x8x128xf32, #tpu.memory_space<vmem>>, %arg6: memref<1x8x128xf32, #tpu.memory_space<vmem>>, %arg7: memref<8x128xf32, #tpu.memory_space<vmem>>, %arg8: memref<8x128xf32, #tpu.memory_space<vmem>>) attributes {dimension_semantics = [#tpu.dimension_semantics<parallel>, #tpu.dimension_semantics<arbitrary>], iteration_bounds = array<i64: 2, 1>, scalar_prefetch = 0 : i64, scratch_operands = 2 : i64, tpu.core_type = #tpu.core_type<tc>, window_params = [{transform_indices = @transform_0, window_bounds = array<i64: 64, 128>}, {pipeline_mode = #tpu.pipeline_mode<synchronous>, transform_indices = @transform_1, window_bounds = array<i64: 128, 128>}, {transform_indices = @transform_2, window_bounds = array<i64: 64, 128>}, {transform_indices = @transform_3, window_bounds = array<i64: 1, 8, 128>}, {transform_indices = @transform_4, window_bounds = array<i64: 1, 8, 128>}]} {
    %c0_i32 = arith.constant 0 : i32
    %0 = arith.cmpi eq, %arg1, %c0_i32 : i32
    %1 = arith.extui %0 : i1 to i32
    %c0_i32_0 = arith.constant 0 : i32
    %2 = arith.cmpi ne, %1, %c0_i32_0 : i32
    scf.if %2 {
      %cst_18 = arith.constant 0.000000e+00 : f32
      %21 = vector.broadcast %cst_18 : f32 to vector<8x128xf32>
      %c0_19 = arith.constant 0 : index
      %c0_20 = arith.constant 0 : index
      %22 = vector.load %arg7[%c0_19, %c0_20] : memref<8x128xf32, #tpu.memory_space<vmem>>, vector<8x128xf32>
      tpu.vector_store %arg7[%c0_19, %c0_20], %21 {strides = array<i32>} : memref<8x128xf32, #tpu.memory_space<vmem>>, vector<8x128xf32>,
      %cst_21 = arith.constant 0.000000e+00 : f32
      %23 = vector.broadcast %cst_21 : f32 to vector<8x128xf32>
      %c0_22 = arith.constant 0 : index
      %c0_23 = arith.constant 0 : index
      %24 = vector.load %arg8[%c0_22, %c0_23] : memref<8x128xf32, #tpu.memory_space<vmem>>, vector<8x128xf32>
      tpu.vector_store %arg8[%c0_22, %c0_23], %23 {strides = array<i32>} : memref<8x128xf32, #tpu.memory_space<vmem>>, vector<8x128xf32>,
    } else {
    }
    %c0 = arith.constant 0 : index
    %c0_1 = arith.constant 0 : index
    %3 = vector.load %arg2[%c0, %c0_1] : memref<64x128xbf16, #tpu.memory_space<vmem>>, vector<64x128xbf16>
    %c0_2 = arith.constant 0 : index
    %c0_3 = arith.constant 0 : index
    %4 = vector.load %arg3[%c0_2, %c0_3] : memref<128x128xbf16, #tpu.memory_space<vmem>>, vector<128x128xbf16>
    %cst = arith.constant dense<0.000000e+00> : vector<64x128xf32>
    %5 = tpu.matmul %3, %4, %cst {dimension_numbers = #tpu.dot_dimension_numbers<[1], [0], [0], [1], [0, 0, 1, 1], [], []>} : vector<64x128xbf16>, vector<128x128xbf16>, vector<64x128xf32> -> vector<64x128xf32>
    %6 = vector.shape_cast %5 : vector<64x128xf32> to vector<8x8x128xf32>
    %c0_4 = arith.constant 0 : index
    %c0_5 = arith.constant 0 : index
    %7 = vector.load %arg7[%c0_4, %c0_5] : memref<8x128xf32, #tpu.memory_space<vmem>>, vector<8x128xf32>
    %cst_6 = arith.constant dense<0.000000e+00> : vector<8x128xf32>
    %8 = vector.multi_reduction <add>, %6, %cst_6 [0] : vector<8x8x128xf32> to vector<8x128xf32>
    %9 = arith.addf %7, %8 : vector<8x128xf32>
    %c0_7 = arith.constant 0 : index
    %c0_8 = arith.constant 0 : index
    %10 = vector.load %arg7[%c0_7, %c0_8] : memref<8x128xf32, #tpu.memory_space<vmem>>, vector<8x128xf32>
    tpu.vector_store %arg7[%c0_7, %c0_8], %9 {strides = array<i32>} : memref<8x128xf32, #tpu.memory_space<vmem>>, vector<8x128xf32>,
    %c0_9 = arith.constant 0 : index
    %c0_10 = arith.constant 0 : index
    %11 = vector.load %arg8[%c0_9, %c0_10] : memref<8x128xf32, #tpu.memory_space<vmem>>, vector<8x128xf32>
    %12 = arith.mulf %6, %6 : vector<8x8x128xf32>
    %cst_11 = arith.constant dense<0.000000e+00> : vector<8x128xf32>
    %13 = vector.multi_reduction <add>, %12, %cst_11 [0] : vector<8x8x128xf32> to vector<8x128xf32>
    %14 = arith.addf %11, %13 : vector<8x128xf32>
    %c0_12 = arith.constant 0 : index
    %c0_13 = arith.constant 0 : index
    %15 = vector.load %arg8[%c0_12, %c0_13] : memref<8x128xf32, #tpu.memory_space<vmem>>, vector<8x128xf32>
    tpu.vector_store %arg8[%c0_12, %c0_13], %14 {strides = array<i32>} : memref<8x128xf32, #tpu.memory_space<vmem>>, vector<8x128xf32>,
    %16 = arith.truncf %5 : vector<64x128xf32> to vector<64x128xbf16>
    %c0_14 = arith.constant 0 : index
    %c0_15 = arith.constant 0 : index
    %17 = vector.load %arg4[%c0_14, %c0_15] : memref<64x128xbf16, #tpu.memory_space<vmem>>, vector<64x128xbf16>
    tpu.vector_store %arg4[%c0_14, %c0_15], %16 {strides = array<i32>} : memref<64x128xbf16, #tpu.memory_space<vmem>>, vector<64x128xbf16>,
    %c0_i32_16 = arith.constant 0 : i32
    %18 = arith.cmpi eq, %arg1, %c0_i32_16 : i32
    %19 = arith.extui %18 : i1 to i32
    %c0_i32_17 = arith.constant 0 : i32
    %20 = arith.cmpi ne, %19, %c0_i32_17 : i32
    scf.if %20 {
      %c0_18 = arith.constant 0 : index
      %c0_19 = arith.constant 0 : index
      %21 = vector.load %arg7[%c0_18, %c0_19] : memref<8x128xf32, #tpu.memory_space<vmem>>, vector<8x128xf32>
      %c0_20 = arith.constant 0 : index
      %c0_21 = arith.constant 0 : index
      %c0_22 = arith.constant 0 : index
      %22 = vector.load %arg5[%c0_20, %c0_21, %c0_22] : memref<1x8x128xf32, #tpu.memory_space<vmem>>, vector<1x8x128xf32>
      %23 = vector.shape_cast %22 : vector<1x8x128xf32> to vector<8x128xf32>
      %24 = vector.shape_cast %21 : vector<8x128xf32> to vector<1x8x128xf32>
      tpu.vector_store %arg5[%c0_20, %c0_21, %c0_22], %24 {strides = array<i32>} : memref<1x8x128xf32, #tpu.memory_space<vmem>>, vector<1x8x128xf32>,
      %c0_23 = arith.constant 0 : index
      %c0_24 = arith.constant 0 : index
      %25 = vector.load %arg8[%c0_23, %c0_24] : memref<8x128xf32, #tpu.memory_space<vmem>>, vector<8x128xf32>
      %c0_25 = arith.constant 0 : index
      %c0_26 = arith.constant 0 : index
      %c0_27 = arith.constant 0 : index
      %26 = vector.load %arg6[%c0_25, %c0_26, %c0_27] : memref<1x8x128xf32, #tpu.memory_space<vmem>>, vector<1x8x128xf32>
      %27 = vector.shape_cast %26 : vector<1x8x128xf32> to vector<8x128xf32>
      %28 = vector.shape_cast %25 : vector<8x128xf32> to vector<1x8x128xf32>
      tpu.vector_store %arg6[%c0_25, %c0_26, %c0_27], %28 {strides = array<i32>} : memref<1x8x128xf32, #tpu.memory_space<vmem>>, vector<1x8x128xf32>,
    } else {
    }
    return
  }
  func.func @transform_0(%arg0: i32, %arg1: i32) -> (i32, i32) {
    %c1_i32 = arith.constant 1 : i32
    %0 = arith.muli %arg0, %c1_i32 : i32
    %1 = arith.addi %0, %arg1 : i32
    %c0_i32 = arith.constant 0 : i32
    %c0_i32_0 = arith.constant 0 : i32
    return %1, %c0_i32 : i32, i32
  }
  func.func @transform_1(%arg0: i32, %arg1: i32) -> (i32, i32) {
    %c0_i32 = arith.constant 0 : i32
    %c0_i32_0 = arith.constant 0 : i32
    %c0_i32_1 = arith.constant 0 : i32
    return %c0_i32, %c0_i32_0 : i32, i32
  }
  func.func @transform_2(%arg0: i32, %arg1: i32) -> (i32, i32) {
    %c1_i32 = arith.constant 1 : i32
    %0 = arith.muli %arg0, %c1_i32 : i32
    %1 = arith.addi %0, %arg1 : i32
    %c0_i32 = arith.constant 0 : i32
    %c0_i32_0 = arith.constant 0 : i32
    return %1, %c0_i32 : i32, i32
  }
  func.func @transform_3(%arg0: i32, %arg1: i32) -> (i32, i32, i32) {
    %c0_i32 = arith.constant 0 : i32
    %c0_i32_0 = arith.constant 0 : i32
    %c0_i32_1 = arith.constant 0 : i32
    return %arg0, %c0_i32, %c0_i32_0 : i32, i32, i32
  }
  func.func @transform_4(%arg0: i32, %arg1: i32) -> (i32, i32, i32) {
    %c0_i32 = arith.constant 0 : i32
    %c0_i32_0 = arith.constant 0 : i32
    %c0_i32_1 = arith.constant 0 : i32
    return %arg0, %c0_i32, %c0_i32_0 : i32, i32, i32
  }
}

module attributes {stable_mosaic.version = 11 : i64} {
  func.func @_bn_lrelu_kernel(%arg0: i32, %arg1: memref<64x128xbf16, #tpu.memory_space<vmem>>, %arg2: memref<1x128xf32, #tpu.memory_space<vmem>>, %arg3: memref<1x128xf32, #tpu.memory_space<vmem>>, %arg4: memref<64x128xf32, #tpu.memory_space<vmem>>) attributes {dimension_semantics = [#tpu.dimension_semantics<parallel>], iteration_bounds = array<i64: 2>, scalar_prefetch = 0 : i64, scratch_operands = 0 : i64, tpu.core_type = #tpu.core_type<tc>, window_params = [{transform_indices = @transform_0, window_bounds = array<i64: 64, 128>}, {pipeline_mode = #tpu.pipeline_mode<synchronous>, transform_indices = @transform_1, window_bounds = array<i64: 1, 128>}, {pipeline_mode = #tpu.pipeline_mode<synchronous>, transform_indices = @transform_2, window_bounds = array<i64: 1, 128>}, {transform_indices = @transform_3, window_bounds = array<i64: 64, 128>}]} {
    %c0 = arith.constant 0 : index
    %c0_0 = arith.constant 0 : index
    %0 = vector.load %arg1[%c0, %c0_0] : memref<64x128xbf16, #tpu.memory_space<vmem>>, vector<64x128xbf16>
    %1 = arith.extf %0 : vector<64x128xbf16> to vector<64x128xf32>
    %c0_1 = arith.constant 0 : index
    %c0_2 = arith.constant 0 : index
    %2 = vector.load %arg2[%c0_1, %c0_2] : memref<1x128xf32, #tpu.memory_space<vmem>>, vector<1x128xf32>
    %3 = vector.broadcast %2 : vector<1x128xf32> to vector<64x128xf32>
    %4 = arith.mulf %1, %3 : vector<64x128xf32>
    %c0_3 = arith.constant 0 : index
    %c0_4 = arith.constant 0 : index
    %5 = vector.load %arg3[%c0_3, %c0_4] : memref<1x128xf32, #tpu.memory_space<vmem>>, vector<1x128xf32>
    %6 = vector.broadcast %5 : vector<1x128xf32> to vector<64x128xf32>
    %7 = arith.addf %4, %6 : vector<64x128xf32>
    %cst = arith.constant 0.000000e+00 : f32
    %8 = vector.broadcast %cst : f32 to vector<64x128xf32>
    %9 = arith.cmpf oge, %7, %8 : vector<64x128xf32>
    %cst_5 = arith.constant 2.000000e-01 : f32
    %10 = vector.broadcast %cst_5 : f32 to vector<64x128xf32>
    %11 = arith.mulf %10, %7 : vector<64x128xf32>
    %12 = arith.select %9, %7, %11 : vector<64x128xi1>, vector<64x128xf32>
    %c0_6 = arith.constant 0 : index
    %c0_7 = arith.constant 0 : index
    %13 = vector.load %arg4[%c0_6, %c0_7] : memref<64x128xf32, #tpu.memory_space<vmem>>, vector<64x128xf32>
    tpu.vector_store %arg4[%c0_6, %c0_7], %12 {strides = array<i32>} : memref<64x128xf32, #tpu.memory_space<vmem>>, vector<64x128xf32>,
    return
  }
  func.func @transform_0(%arg0: i32) -> (i32, i32) {
    %c0_i32 = arith.constant 0 : i32
    %c0_i32_0 = arith.constant 0 : i32
    return %arg0, %c0_i32 : i32, i32
  }
  func.func @transform_1(%arg0: i32) -> (i32, i32) {
    %c0_i32 = arith.constant 0 : i32
    %c0_i32_0 = arith.constant 0 : i32
    %c0_i32_1 = arith.constant 0 : i32
    return %c0_i32, %c0_i32_0 : i32, i32
  }
  func.func @transform_2(%arg0: i32) -> (i32, i32) {
    %c0_i32 = arith.constant 0 : i32
    %c0_i32_0 = arith.constant 0 : i32
    %c0_i32_1 = arith.constant 0 : i32
    return %c0_i32, %c0_i32_0 : i32, i32
  }
  func.func @transform_3(%arg0: i32) -> (i32, i32) {
    %c0_i32 = arith.constant 0 : i32
    %c0_i32_0 = arith.constant 0 : i32
    return %arg0, %c0_i32 : i32, i32
  }
}

</mosaic_0001>

<bundles_post_ra>
// kernel: _cnn_block_impl.3
= control target key start
LH: loop header
LB: loop body
LE: loop exit
PB: predicated region body
PF: predicated region fallthrough
CT: control target
= control target key end

     0   :  { %8 = vsyncpa [#allocation3], 0  ;;  %s931_s0 = inlined_call_operand.hbm [shape: bf16[128,128], index: 0, kind: input, shape index: {}]   ;;  %s932_s1 = inlined_call_operand.hbm [shape: f32[1,128], index: 1, kind: input, shape index: {}]   ;;  %s933_s2 = inlined_call_operand.hbm [shape: f32[1,128], index: 2, kind: input, shape index: {}]   ;;  %s934_s3 = inlined_call_operand.hbm [shape: f32[128,128], index: 3, kind: output, shape index: {}]  }
   0x1   :  { %10 = vsyncpa [#allocation3 + $0x1], 0 }
   0x2   :  { %11 = vsyncpa [#allocation6], 0 }
   0x3   :  { %12 = vsyncpa [#allocation4], 0 }
   0x4   :  { %14 = vsyncpa [#allocation4 + $0x1], 0  ;;  %s698_s12 = smov 0   ;;  %s700_s13 = smov 0  }
   0x5   :  { %s702_s14 = smov 0   ;;  %s704_s15 = smov 0  }
   0x6 LB: > { %s719_s16 = sadd.s32 4294967295, %s668_s15   ;;  %s400_s17 = sadd.s32 4294967294, %s668_s15   ;;  %s668_s15 = sphi %s704_s15, %s959_s15   ;;  %s664_s14 = sphi %s702_s14, %s958_s14   ;;  %s660_s13 = sphi %s700_s13, %s957_s13   ;;  %s656_s12 = sphi %s698_s12, %s956_s12  }
   0x7   : > { %s723_s18 = sadd.s32 1, %s668_s15   ;;  %s27_s19 = sadd.s32 1, %s664_s14 }
   0x8   : > { %s24_s20 = ssub.s32 %s668_s15, %s723_s18  ;;  %p34_p0 = scmp.ne.s32.totalorder %s664_s14, %s660_s13 }
   0x9   : > { %p25_p1 = scmp.eq.s32.totalorder %s24_s20, 0  ;;  %p35_p2 = scmp.eq.s32.totalorder %s668_s15, 0 }
   0xa   : > { %p40_p3 = scmp.ne.s32.totalorder %s660_s13, %s656_s12  ;;  %p935_p4 = scmp.eq.s32.totalorder %s719_s16, 0 }
   0xb   : > { %s735_s21 = scalar_select %p25_p1, %s664_s14, %s27_s19  }
   0xc   : > { %p737_p5 = por %p35_p2, %p34_p0  ;;  %p743_p6 = por %p935_p4, %p40_p3 }
   0xd   : > { %p106_p7 = scmp.eq.s32.totalorder %s719_s16, 1  ;;  %p112_p8 = scmp.eq.s32.totalorder %s400_s17, 1 }
   0xe   : > { %s941_s23 = scalar_select %p743_p6, 1, 0 }
   0xf   : > { %p401_p9 = scmp.ge.s32.totalorder %s668_s15, 1  ;;  %p119_p10 = scmp.lt.s32.totalorder %s668_s15, 3 }
  0x10   : > { %p750_p11 = por %p106_p7, %p34_p0  ;;  %p754_p12 = por %p112_p8, %p40_p3 }
  0x11   : > { %p758_p13 = pnand %p401_p9, %p119_p10  ;;  %s670_s27 = smov [#allocation5]  }
  0x12   : > { %s942_s24 = scalar_select %p750_p11, 1, 0 }
  0x13   : > { %s943_s25 = scalar_select %p754_p12, 1, 0 }
  0x14   : > { %s944_s26 = scalar_select %p758_p13, 1, 0 }
  0x15   : > { %p453_p2 = pneg %p758_p13  ;;  %s132_s28 = sshll.u32 %s670_s27, 4  ;;  %s133_s28 = int_to_ptr.vmem [resolvable:$true] %s132_s28 }
  0x16   : > { %p470_p4 = scmp.lt.s32.totalorder %s668_s15, 2  ;;  %p945_p0 = scmp.eq.s32.totalorder %s719_s16, 0 }
  0x17   : > { %s671_s4 = smov [#allocation7]   ;;  %s512_s8 = scalar_lea.hbm %s932_s1, 16 }
  0x18   : > { %p768_p7 = pnand %p453_p2, %p945_p0  ;;  %p774_p3 = pnand %p470_p4, %p737_p5 }
  0x19   : > { %s143_s5 = sshll.u32 %s671_s4, 4  ;;  %p513_p8 = scmp.ne.s32.totalorder %s932_s1, %s512_s8  ;;  %s778_s5 = int_to_ptr.vmem [resolvable:$true] %s143_s5 }
  0x1a   : > { %s947_s30 = scalar_select %p774_p3, 1, 0 }
  0x1b   : > { %p514_p9 = pneg %p768_p7  ;;  %p519_p10 = scmp.lt.u32.totalorder %s512_s8, %s932_s1 }
  0x1d   : > { %p515_p4 = pnand %p514_p9, %p513_p8 }
  0x1f   : > { %p516_p5 = pneg %p515_p4 }
  0x21   : > { %p521_p2 = pnand %p519_p10, %p516_p5 }
  0x23   : > { %524 = shalt.err (!%p521_p2)
}
  0x24   : > { %s525_s19 = scalar_lea.vmem %s133_s28, 16  ;;  %s532_s20 = scalar_lea.vmem %s133_s28, 32 }
  0x25   : > { %p526_p0 = scmp.ne.s32.totalorder %s133_s28, %s525_s19  ;;  %p533_p11 = scmp.lt.s32.totalorder %s133_s28, %s133_s28 }
  0x26   : > { %p534_p6 = scmp.lt.s32.totalorder %s532_s20, %s525_s19 }
  0x27   : > { %p528_p1 = pnand %p526_p0, %p514_p9 }
  0x28   : > { %p535_p13 = por %p534_p6, %p533_p11 }
  0x29   : > { %p529_p12 = pneg %p528_p1 }
  0x2b   : > { %p536_p3 = pnand %p535_p13, %p529_p12 }
  0x2d   : > { %539 = shalt.err (!%p536_p3)
}
  0x2e   : > { %456 = dma.hbm_to_vmem [thread:$0]  (!%p768_p7), %s932_s1, 16, %s133_s28, [#allocation6]  }
  0x2f   : > { %s154_s4 = sand.u32 1, %s664_s14   ;;  %s540_s8 = scalar_lea.hbm %s933_s2, 16 }
  0x30   : > { %p541_p1 = scmp.ne.s32.totalorder %s933_s2, %s540_s8  ;;  %p547_p12 = scmp.lt.u32.totalorder %s540_s8, %s933_s2 }
  0x32   : > { %p543_p6 = pnand %p541_p1, %p514_p9 }
  0x34   : > { %p544_p11 = pneg %p543_p6 }
  0x36   : > { %p549_p13 = pnand %p547_p12, %p544_p11 }
  0x38   : > { %552 = shalt.err (!%p549_p13)
}
  0x39   : > { %s553_s28 = scalar_lea.vmem %s778_s5, 16  ;;  %s560_s19 = scalar_lea.vmem %s778_s5, 32 }
  0x3a   : > { %p554_p3 = scmp.ne.s32.totalorder %s778_s5, %s553_s28  ;;  %p561_p5 = scmp.lt.s32.totalorder %s778_s5, %s778_s5 }
  0x3b   : > { %p562_p10 = scmp.lt.s32.totalorder %s560_s19, %s553_s28 }
  0x3c   : > { %p556_p8 = pnand %p554_p3, %p514_p9 }
  0x3d   : > { %p563_p2 = por %p562_p10, %p561_p5 }
  0x3e   : > { %p557_p4 = pneg %p556_p8 }
  0x40   : > { %p564_p0 = pnand %p563_p2, %p557_p4 }
  0x42   : > { %567 = shalt.err (!%p564_p0)
}
  0x43   : > { %459 = dma.hbm_to_vmem [thread:$0]  (!%p768_p7), %s933_s2, 16, %s778_s5, [#allocation6]  }
  0x44   : > { %s405_s27 = sshll.u32 %s154_s4, 5  ;;  %s420_s6 = sshll.u32 %s668_s15, 9 }
  0x45   : > { %s833_s9 = scalar_lea.hbm %s931_s0, %s420_s6  ;;  %s158_s29 = scalar_lea.vmem [#allocation2], %s405_s27 }
  0x46   : > { %s165_s10 = sshll.u32 %s158_s29, 4  ;;  %s837_s11 = scalar_lea.sflag [#allocation3], %s154_s4  ;;  %s835_s10 = int_to_ptr.vmem [resolvable:$true] %s165_s10 }
  0x47   : > { %s568_s17 = scalar_lea.hbm %s833_s9, 512  ;;  %p948_p7 = scmp.ne.s32.totalorder %s947_s30, 0 }
  0x48   : > { %p569_p9 = scmp.ne.s32.totalorder %s833_s9, %s568_s17  ;;  %s573_s19 = scalar_lea.hbm %s931_s0, 1024 }
  0x49   : > { %p570_p1 = pneg %p948_p7  ;;  %p574_p12 = scmp.lt.u32.totalorder %s833_s9, %s931_s0 }
  0x4a   : > { %p575_p13 = scmp.lt.u32.totalorder %s573_s19, %s568_s17  ;;  %p577_p8 = scmp.lt.u32.totalorder %s568_s17, %s833_s9 }
  0x4b   : > { %p571_p6 = pnand %p570_p1, %p569_p9 }
  0x4c   : > { %p576_p3 = por %p575_p13, %p574_p12 }
  0x4d   : > { %p572_p11 = pneg %p571_p6 }
  0x4e   : > { %p578_p4 = por %p577_p8, %p576_p3 }
  0x50   : > { %p579_p5 = pnand %p578_p4, %p572_p11 }
  0x52   : > { %582 = shalt.err (!%p579_p5)
}
  0x53   : > { %s583_s4 = scalar_lea.vmem %s835_s10, 512  ;;  %s672_s27 = smov [#allocation2]  }
  0x54   : > { %p584_p10 = scmp.ne.s32.totalorder %s835_s10, %s583_s4  ;;  %s588_s6 = sshll.u32 %s672_s27, 4  ;;  %s589_s6 = int_to_ptr.vmem [resolvable:$false] %s588_s6 }
  0x55   : > { %s590_s7 = scalar_lea.vmem %s589_s6, 1024  ;;  %p591_p9 = scmp.lt.s32.totalorder %s835_s10, %s589_s6 }
  0x56   : > { %p586_p2 = pnand %p584_p10, %p570_p1  ;;  %p592_p6 = scmp.lt.s32.totalorder %s590_s7, %s583_s4 }
  0x58   : > { %p587_p0 = pneg %p586_p2  ;;  %p593_p12 = por %p592_p6, %p591_p9 }
  0x5a   : > { %p594_p13 = pnand %p593_p12, %p587_p0 }
  0x5c   : > { %597 = shalt.err (!%p594_p13)
}
  0x5d   : > { %s673_s8 = smov 64   ;;  %s674_s29 = smov 4  }
  0x5e   : > { %463 = dma.hbm_to_vmem [thread:$0]  (!%p948_p7), %s833_s9, 512, %s835_s10, %s837_s11, %s673_s8, %s673_s8, %s674_s29  }
  0x5f   : > { %p949_p1 = scmp.ne.s32.totalorder %s944_s26, 0 }
  0x60   : > { %s868_s17 = sand.u32 (!%p949_p1), 1, %s660_s13   ;;  %p950_p11 = scmp.ne.s32.totalorder (!%p949_p1), %s941_s23, 0 }
  0x61   : > { %177 = sbr.rel (%p949_p1) target bundleno = 138 (0x8a), region = 32  ;;  %s409_s5 = sshll.u32 (!%p949_p1), %s868_s17, 5 }
  0x62   : > { %s180_s28 = scalar_lea.sflag (!%p949_p1), [#allocation3], %s868_s17  ;;  %s183_s19 = scalar_lea.vmem (!%p949_p1), [#allocation2], %s409_s5 }
  0x68   : > { %643 = dma.done.wait (%p950_p11), %s180_s28, 512  }
  0x69   : > { %645 = vsyncadd (%p950_p11), %s180_s28, 4294966784  ;;  %p951_p3 = scmp.eq.s32.totalorder %s719_s16, 0 }
  0x6b   : > { %647 = dma.done.wait (%p951_p3), [#allocation6], 32   ;;  %p952_p7 = pmov %p951_p3 }
  0x6c   : > { %v423_v0 = vld [vmem:[%s183_s19] sm:$0xff]   ;;  %v438_v4 = vld [vmem:[%s183_s19 + $0x8] sm:$0xff]   ;;  %v439_v5 = vld [vmem:[%s183_s19 + $0x10] sm:$0xff]   ;;  %s412_s23 = sshll.u32 %s868_s17, 6  ;;  %s421_s9 = sshll.u32 %s719_s16, 10 }
  0x6d   : > { %649 = vsyncadd (%p952_p7), [#allocation6], 4294967264  ;;  %v413_v1 = vld [vmem:[#allocation5] ss:$0 sm:$0xff]  ;;  %v424_v2 = vunpack.c.l.bf16 %v423_v0  ;;  %v425_v3 = vunpack.c.h.bf16 %v423_v0  ;;  %v440_v6 = vld [vmem:[%s183_s19 + $0x18] sm:$0xff]   ;;  %v428_v8 = vunpack.c.l.bf16 %v438_v4  ;;  %v429_v9 = vunpack.c.h.bf16 %v438_v4  ;;  %s213_s26 = scalar_lea.vmem [#allocation8], %s412_s23  ;;  %s887_s11 = scalar_lea.hbm %s934_s3, %s421_s9 }
  0x6e   : > { %v414_v7 = vld [vmem:[#allocation7] ss:$0 sm:$0xff]  ;;  %v432_v10 = vunpack.c.l.bf16 %v439_v5  ;;  %v433_v11 = vunpack.c.h.bf16 %v439_v5  ;;  %v436_v14 = vunpack.c.l.bf16 %v440_v6  ;;  %v437_v15 = vunpack.c.h.bf16 %v440_v6  ;;  %s308_s30 = sshll.u32 %s213_s26, 4  ;;  %s295_s20 = scalar_lea.sflag [#allocation4], %s868_s17  ;;  %s882_s30 = int_to_ptr.vmem [resolvable:$true] %s308_s30 }
  0x6f   : > { %v239_v12 = vmul.f32 %v424_v2, %v413_v1  ;;  %v240_v13 = vmul.f32 %v425_v3, %v413_v1  ;;  %v241_v16 = vmul.f32 %v428_v8, %v413_v1  ;;  %v242_v17 = vmul.f32 %v429_v9, %v413_v1  ;;  %s598_s22 = scalar_lea.vmem %s882_s30, 1024  ;;  %p953_p4 = scmp.ne.s32.totalorder %s942_s24, 0 }
  0x70   : > { %v243_v18 = vmul.f32 %v432_v10, %v413_v1  ;;  %v244_v19 = vmul.f32 %v433_v11, %v413_v1  ;;  %v245_v22 = vmul.f32 %v436_v14, %v413_v1  ;;  %v246_v23 = vmul.f32 %v437_v15, %v413_v1  ;;  %p599_p8 = scmp.ne.s32.totalorder %s882_s30, %s598_s22  ;;  %s675_s4 = smov [#allocation8]  }
  0x71   : > { %v254_v20 = vadd.f32 %v414_v7, %v239_v12  ;;  %v255_v21 = vadd.f32 %v414_v7, %v240_v13  ;;  %v256_v24 = vadd.f32 %v414_v7, %v241_v16  ;;  %v257_v25 = vadd.f32 %v414_v7, %v242_v17  ;;  %s602_s27 = sshll.u32 %s675_s4, 4  ;;  %s603_s27 = int_to_ptr.vmem [resolvable:$false] %s602_s27 }
  0x72   : > { %v258_v26 = vadd.f32 %v414_v7, %v243_v18  ;;  %v259_v27 = vadd.f32 %v414_v7, %v244_v19  ;;  %v260_v39 = vadd.f32 %v414_v7, %v245_v22  ;;  %v261_v40 = vadd.f32 %v414_v7, %v246_v23  ;;  %p600_p5 = pnand %p599_p8, %p953_p4  ;;  %s604_s6 = scalar_lea.vmem %s603_s27, 2048 }
  0x73   : > { %vm262_vm0 = vcmp.ge.f32.partialorder %v254_v20, 0.0  ;;  %v270_v28 = vmul.f32 0.2, %v254_v20  ;;  %vm263_vm1 = vcmp.ge.f32.partialorder %v255_v21, 0.0  ;;  %v271_v29 = vmul.f32 0.2, %v255_v21  ;;  %p605_p2 = scmp.lt.s32.totalorder %s882_s30, %s603_s27  ;;  %p606_p0 = scmp.lt.s32.totalorder %s604_s6, %s598_s22 }
  0x74   : > { %vm264_vm2 = vcmp.ge.f32.partialorder %v256_v24, 0.0  ;;  %v272_v30 = vmul.f32 0.2, %v256_v24  ;;  %vm265_vm3 = vcmp.ge.f32.partialorder %v257_v25, 0.0  ;;  %v273_v31 = vmul.f32 0.2, %v257_v25  ;;  %p601_p10 = pneg %p600_p5 }
  0x75   : > { %v278_v32 = vsel %vm262_vm0, %v254_v20, %v270_v28  ;;  %v279_v33 = vsel %vm263_vm1, %v255_v21, %v271_v29  ;;  %vm266_vm4 = vcmp.ge.f32.partialorder %v258_v26, 0.0  ;;  %v274_v34 = vmul.f32 0.2, %v258_v26  ;;  %p607_p9 = por %p606_p0, %p605_p2 }
  0x76   : > { %286 = vst [vmem:[%s213_s26] sm:$0xff] %v278_v32  ;;  %287 = vst [vmem:[%s213_s26 + $0x8] sm:$0xff] %v279_v33  ;;  %v280_v35 = vsel %vm264_vm2, %v256_v24, %v272_v30  ;;  %v281_v36 = vsel %vm265_vm3, %v257_v25, %v273_v31  ;;  %vm267_vm5 = vcmp.ge.f32.partialorder %v259_v27, 0.0  ;;  %v275_v37 = vmul.f32 0.2, %v259_v27 }
  0x77   : > { %288 = vst [vmem:[%s213_s26 + $0x10] sm:$0xff] %v280_v35  ;;  %289 = vst [vmem:[%s213_s26 + $0x18] sm:$0xff] %v281_v36  ;;  %v282_v38 = vsel %vm266_vm4, %v258_v26, %v274_v34  ;;  %vm268_vm6 = vcmp.ge.f32.partialorder %v260_v39, 0.0  ;;  %v276_v42 = vmul.f32 0.2, %v260_v39  ;;  %vm269_vm7 = vcmp.ge.f32.partialorder %v261_v40, 0.0  ;;  %p608_p6 = pnand %p607_p9, %p601_p10 }
  0x78   : > { %290 = vst [vmem:[%s213_s26 + $0x20] sm:$0xff] %v282_v38  ;;  %v283_v41 = vsel %vm267_vm5, %v259_v27, %v275_v37  ;;  %v277_v43 = vmul.f32 0.2, %v261_v40 }
  0x79   : > { %291 = vst [vmem:[%s213_s26 + $0x28] sm:$0xff] %v283_v41  ;;  %v284_v44 = vsel %vm268_vm6, %v260_v39, %v276_v42 }
  0x7a   : > { %v285_v45 = vsel %vm269_vm7, %v261_v40, %v277_v43  ;;  %292 = vst [vmem:[%s213_s26 + $0x30] sm:$0xff] %v284_v44 }
  0x7b   : > { %293 = vst [vmem:[%s213_s26 + $0x38] sm:$0xff] %v285_v45 }
  0x7c   : > { %611 = shalt.err (!%p608_p6)
}
  0x7d   : > { %s612_s7 = scalar_lea.hbm %s887_s11, 1024  ;;  %s616_s5 = scalar_lea.hbm %s934_s3, 2048 }
  0x7e   : > { %p613_p12 = scmp.ne.s32.totalorder %s887_s11, %s612_s7  ;;  %p617_p11 = scmp.lt.u32.totalorder %s887_s11, %s934_s3 }
  0x7f   : > { %p618_p3 = scmp.lt.u32.totalorder %s616_s5, %s612_s7  ;;  %p620_p8 = scmp.lt.u32.totalorder %s612_s7, %s887_s11 }
  0x80   : > { %p614_p13 = pnand %p613_p12, %p953_p4 }
  0x81   : > { %p619_p7 = por %p618_p3, %p617_p11 }
  0x82   : > { %p615_p1 = pneg %p614_p13 }
  0x83   : > { %p621_p5 = por %p620_p8, %p619_p7 }
  0x85   : > { %p622_p10 = pnand %p621_p5, %p615_p1 }
  0x87   : > { %625 = shalt.err (!%p622_p10)
}
  0x88   : > { %s676_s23 = smov 128   ;;  %s677_s26 = smov 8  }
  0x89   : > { %451 = dma.vmem_to_hbm [thread:$0]  (%p953_p4), %s882_s30, 1024, %s887_s11, %s295_s20, %s676_s23, %s676_s23, %s677_s26  }
  0x8a PF: > { %s323_s9 = sand.u32 1, %s656_s12   ;;  %p954_p2 = scmp.ne.s32.totalorder %s943_s25, 0 }
  0x8b   : > { %p955_p0 = scmp.ge.s32.totalorder %s668_s15, 2  ;;  %s324_s16 = scalar_lea.sflag [#allocation4], %s323_s9 }
  0x8d   : > { %p465_p9 = pnand %p955_p0, %p954_p2 }
  0x8f   : > { %651 = dma.done.wait (!%p465_p9), %s324_s16, 1024  }
  0x90   : > { %653 = vsyncadd (!%p465_p9), %s324_s16, 4294966272  ;;  %p17_p6 = scmp.ge.s32.totalorder %s723_s18, 4   ;;  %s956_s12 = smov %s660_s13 }
  0x91   : > { %s957_s13 = smov %s664_s14  ;;  %s958_s14 = smov %s735_s21 }
  0x92   : > { %s959_s15 = smov %s723_s18  ;;  %19 = sbr.rel (!%p17_p6) target bundleno = 6 (0x6), region = 85 }
  0x99   :  { %329 = vsyncpa [#allocation3], 1 }
  0x9a   :  { %331 = vsyncpa [#allocation3 + $0x1], 1 }
  0x9b   :  { %332 = vsyncpa [#allocation6], 1 }
  0x9c   :  { %333 = vsyncpa [#allocation4], 1 }
  0x9d   :  { %335 = vsyncpa [#allocation4 + $0x1], 1 }

// kernel: _cnn_block_impl.2
= control target key start
LH: loop header
LB: loop body
LE: loop exit
PB: predicated region body
PF: predicated region fallthrough
CT: control target
= control target key end

     0   :  { %10 = vsyncpa [#allocation5], 0  ;;  %s1503_s0 = inlined_call_operand.hbm [shape: bf16[128,128], index: 0, kind: input, shape index: {}]   ;;  %s1504_s1 = inlined_call_operand.hbm [shape: bf16[128,128], index: 1, kind: input, shape index: {}]   ;;  %s1505_s2 = inlined_call_operand.hbm [shape: bf16[128,128], index: 2, kind: output, shape index: {0}]   ;;  %s1506_s3 = inlined_call_operand.hbm [shape: f32[2,8,128], index: 3, kind: output, shape index: {1}]   ;;  %s1507_s4 = inlined_call_operand.hbm [shape: f32[2,8,128], index: 4, kind: output, shape index: {2}]  }
   0x1   :  { %12 = vsyncpa [#allocation5 + $0x1], 0 }
   0x2   :  { %13 = vsyncpa [#allocation8], 0 }
   0x3   :  { %14 = vsyncpa [#allocation6], 0 }
   0x4   :  { %16 = vsyncpa [#allocation6 + $0x1], 0 }
   0x5   :  { %17 = vsyncpa [#allocation11], 0 }
   0x6   :  { %19 = vsyncpa [#allocation11 + $0x1], 0  ;;  %s1185_s15 = smov 0   ;;  %s1187_s16 = smov 0  }
   0x7   :  { %s1189_s17 = smov 0   ;;  %s1191_s18 = smov 0  }
   0x8   :  { %s1193_s19 = smov 0   ;;  %s1195_s20 = smov 0  }
   0x9 LB: > { %s1216_s21 = sadd.s32 4294967295, %s1149_s20   ;;  %s1511_s22 = sadd.s32 4294967294, %s1149_s20   ;;  %s1149_s20 = sphi %s1195_s20, %s25_s20   ;;  %s1145_s19 = sphi %s1193_s19, %s1531_s19   ;;  %s1141_s18 = sphi %s1191_s18, %s1530_s18   ;;  %s1137_s17 = sphi %s1189_s17, %s1529_s17   ;;  %s1133_s16 = sphi %s1187_s16, %s1528_s16   ;;  %s1129_s15 = sphi %s1185_s15, %s1527_s15  }
   0xa   : > { %p59_p0 = scmp.ne.s32.totalorder %s1133_s16, %s1129_s15  ;;  %p1508_p1 = scmp.eq.s32.totalorder %s1216_s21, 0 }
   0xb   : > { %p112_p3 = scmp.eq.s32.totalorder %s1511_s22, 1  ;;  %p720_p5 = scmp.ge.s32.totalorder %s1149_s20, 1 }
   0xc   : > { %p1227_p4 = por %p1508_p1, %p59_p0  ;;  %p171_p7 = scmp.lt.s32.totalorder %s1149_s20, 3 }
   0xd   : > { %p1232_p6 = por %p112_p3, %p59_p0  ;;  %s1151_s26 = smov [#allocation7]  }
   0xe   : > { %s1512_s23 = scalar_select %p1227_p4, 1, 0 }
   0xf   : > { %s1513_s24 = scalar_select %p1232_p6, 1, 0 }
  0x10   : > { %p1237_p8 = pnand %p720_p5, %p171_p7  ;;  %s183_s27 = sshll.u32 %s1151_s26, 4  ;;  %s184_s27 = int_to_ptr.vmem [resolvable:$true] %s183_s27 }
  0x11   : > { %s37_s29 = sadd.s32 1, %s1145_s19  ;;  %s945_s6 = scalar_lea.hbm %s1504_s1, 1024 }
  0x12   : > { %s1514_s25 = scalar_select %p1237_p8, 1, 0 }
  0x13   : > { %p858_p9 = pneg %p1237_p8  ;;  %p946_p12 = scmp.ne.s32.totalorder %s1504_s1, %s945_s6 }
  0x14   : > { %p952_p5 = scmp.lt.u32.totalorder %s945_s6, %s1504_s1 }
  0x15   : > { %p1246_p11 = pnand %p858_p9, %p1508_p1 }
  0x17   : > { %p947_p13 = pneg %p1246_p11 }
  0x19   : > { %p948_p0 = pnand %p947_p13, %p946_p12 }
  0x1b   : > { %p949_p3 = pneg %p948_p0 }
  0x1d   : > { %p954_p7 = pnand %p952_p5, %p949_p3 }
  0x1f   : > { %957 = shalt.err (!%p954_p7)
}
  0x20   : > { %s958_s11 = scalar_lea.vmem %s184_s27, 1024  ;;  %p966_p2 = scmp.lt.s32.totalorder %s184_s27, %s184_s27 }
  0x21   : > { %p959_p9 = scmp.ne.s32.totalorder %s184_s27, %s958_s11  ;;  %p967_p6 = scmp.lt.s32.totalorder %s958_s11, %s958_s11 }
  0x23   : > { %p961_p10 = pnand %p959_p9, %p947_p13  ;;  %p968_p4 = por %p967_p6, %p966_p2 }
  0x25   : > { %p962_p1 = pneg %p961_p10 }
  0x27   : > { %p969_p8 = pnand %p968_p4, %p962_p1 }
  0x29   : > { %972 = shalt.err (!%p969_p8)
}
  0x2a   : > { %s1152_s12 = smov 64   ;;  %s1153_s13 = smov 4  }
  0x2b   : > { %861 = dma.hbm_to_vmem [thread:$0]  (!%p1246_p11), %s1504_s1, 1024, %s184_s27, [#allocation8], %s1152_s12, %s1152_s12, %s1153_s13  }
  0x2c   : > { %p39_p1 = scmp.ge.s32.totalorder %s37_s29, 2  ;;  %s46_s30 = sadd.s32 1, %s1137_s17 }
  0x2d   : > { %p53_p2 = scmp.ne.s32.totalorder %s1137_s17, %s1133_s16  ;;  %p54_p4 = scmp.eq.s32.totalorder %s1149_s20, 0 }
  0x2e   : > { %s1533_s29 = smov (%p39_p1, %s37_s29), 0  ;;  %p1517_p8 = scmp.eq.s32.totalorder %s1216_s21, 1 }
  0x2f   : > { %p1276_p6 = por %p54_p4, %p53_p2  ;;  %s43_s6 = ssub.s32 %s1145_s19, %s1533_s29 }
  0x30   : > { %p1282_p10 = por %p1517_p8, %p53_p2  ;;  %p877_p12 = scmp.lt.s32.totalorder %s1149_s20, 2 }
  0x31   : > { %p44_p11 = scmp.eq.s32.totalorder %s43_s6, 0  ;;  %s197_s27 = sand.u32 1, %s1137_s17  }
  0x32   : > { %s723_s7 = sshll.u32 %s197_s27, 5  ;;  %s761_s9 = sshll.u32 %s1145_s19, 9 }
  0x33   : > { %s1291_s8 = scalar_select %p44_p11, %s1137_s17, %s46_s30  }
  0x34   : > { %s1297_s14 = scalar_lea.hbm %s1503_s0, %s761_s9  ;;  %s201_s26 = scalar_lea.vmem [#allocation4], %s723_s7 }
  0x35   : > { %s209_s22 = sshll.u32 %s201_s26, 4  ;;  %p1303_p13 = pnand %p877_p12, %p1276_p6  ;;  %s1299_s22 = int_to_ptr.vmem [resolvable:$true] %s209_s22 }
  0x36   : > { %s1307_s30 = scalar_lea.sflag [#allocation5], %s197_s27  ;;  %s973_s10 = scalar_lea.hbm %s1297_s14, 512 }
  0x37   : > { %p974_p0 = scmp.ne.s32.totalorder %s1297_s14, %s973_s10  ;;  %p975_p3 = pneg %p1303_p13 }
  0x38   : > { %s978_s5 = scalar_lea.hbm %s1503_s0, 1024  ;;  %p979_p9 = scmp.lt.u32.totalorder %s1297_s14, %s1503_s0 }
  0x39   : > { %p976_p5 = pnand %p975_p3, %p974_p0  ;;  %p980_p1 = scmp.lt.u32.totalorder %s978_s5, %s973_s10 }
  0x3a   : > { %p982_p4 = scmp.lt.u32.totalorder %s973_s10, %s1297_s14 }
  0x3b   : > { %p977_p7 = pneg %p976_p5  ;;  %p981_p2 = por %p980_p1, %p979_p9 }
  0x3d   : > { %p983_p6 = por %p982_p4, %p981_p2 }
  0x3f   : > { %p984_p8 = pnand %p983_p6, %p977_p7 }
  0x41   : > { %987 = shalt.err (!%p984_p8)
}
  0x42   : > { %s988_s27 = scalar_lea.vmem %s1299_s22, 512  ;;  %s1154_s7 = smov [#allocation4]  }
  0x43   : > { %p989_p12 = scmp.ne.s32.totalorder %s1299_s22, %s988_s27  ;;  %s993_s9 = sshll.u32 %s1154_s7, 4  ;;  %s994_s9 = int_to_ptr.vmem [resolvable:$false] %s993_s9 }
  0x44   : > { %s995_s11 = scalar_lea.vmem %s994_s9, 1024  ;;  %p996_p5 = scmp.lt.s32.totalorder %s1299_s22, %s994_s9 }
  0x45   : > { %p991_p11 = pnand %p989_p12, %p975_p3  ;;  %p997_p9 = scmp.lt.s32.totalorder %s995_s11, %s988_s27 }
  0x47   : > { %p992_p0 = pneg %p991_p11  ;;  %p998_p1 = por %p997_p9, %p996_p5 }
  0x49   : > { %p999_p2 = pnand %p998_p1, %p992_p0 }
  0x4b   : > { %1002 = shalt.err (!%p999_p2)
}
  0x4c   : > { %865 = dma.hbm_to_vmem [thread:$0]  (!%p1303_p13), %s1297_s14, 512, %s1299_s22, %s1307_s30, %s1152_s12, %s1152_s12, %s1153_s13  }
  0x4d   : > { %p1520_p3 = scmp.ne.s32.totalorder %s1514_s25, 0 }
  0x4e   : > { %s1341_s10 = sand.u32 (!%p1520_p3), 1, %s1133_s16   ;;  %p1521_p7 = scmp.ne.s32.totalorder (!%p1520_p3), %s1512_s23, 0 }
  0x4f   : > { %221 = sbr.rel (%p1520_p3) target bundleno = 406 (0x196), region = 28  ;;  %s727_s5 = sshll.u32 (!%p1520_p3), %s1341_s10, 5 }
  0x50   : > { %s224_s26 = scalar_lea.sflag (!%p1520_p3), [#allocation5], %s1341_s10  ;;  %s1347_s6 = scalar_lea.vmem (!%p1520_p3), [#allocation4], %s727_s5 }
  0x56   : > { %1112 = dma.done.wait (%p1521_p7), %s224_s26, 512  }
  0x57   : > { %1114 = vsyncadd (%p1521_p7), %s224_s26, 4294966784  ;;  %p1522_p13 = scmp.eq.s32.totalorder %s1216_s21, 0 }
  0x59   : > { %1116 = dma.done.wait (%p1522_p13), [#allocation8], 1024   ;;  %p1523_p4 = pmov %p1522_p13 }
  0x5a   : > { %v933_v0 = vld [vmem:[#allocation7] sm:$0xff]   ;;  %v934_v1 = vld [vmem:[#allocation7 + $0x8] sm:$0xff]   ;;  %v935_v2 = vld [vmem:[#allocation7 + $0x10] sm:$0xff]   ;;  %s251_s22 = scalar_lea.vmem [#allocation9], %s727_s5  ;;  %s770_s25 = sshll.u32 %s1141_s18, 9 }
  0x5b   : > { %1118 = vsyncadd (%p1523_p4), [#allocation8], 4294966272  ;;  %806 = vmatprep.subr.bf16.mxu0 %v933_v0  ;;  %830 = vmatprep.subr.bf16.mxu1 %v933_v0  ;;  %v936_v3 = vld [vmem:[#allocation7 + $0x18] sm:$0xff]   ;;  %v941_v4 = vld [vmem:[%s1347_s6] sm:$0xff]   ;;  %s538_s23 = sshll.u32 %s251_s22, 4  ;;  %s1375_s14 = scalar_lea.hbm %s1505_s2, %s770_s25  ;;  %s1368_s23 = int_to_ptr.vmem [resolvable:$true] %s538_s23 }
  0x5c   : > { %807 = vmatpush3.bf16.msra.mxu0 %v933_v0  ;;  %838 = vmatpush3.bf16.msra.mxu1 %v933_v0  ;;  %v943_v5 = vld [vmem:[%s1347_s6 + $0x10] sm:$0xff]   ;;  %v937_v6 = vld [vmem:[#allocation7 + $0x20] sm:$0xff]   ;;  %v938_v7 = vld [vmem:[#allocation7 + $0x28] sm:$0xff]   ;;  %s730_s30 = sshll.u32 %s1341_s10, 3  ;;  %s514_s27 = scalar_lea.sflag [#allocation6], %s1341_s10 }
  0x5d   : > { %808 = vmatprep.subr.bf16.mxu0 %v934_v1  ;;  %831 = vmatprep.subr.bf16.mxu1 %v934_v1  ;;  %v939_v8 = vld [vmem:[#allocation7 + $0x30] sm:$0xff]   ;;  %v940_v9 = vld [vmem:[#allocation7 + $0x38] sm:$0xff]   ;;  %v942_v10 = vld [vmem:[%s1347_s6 + $0x8] sm:$0xff]   ;;  %s1003_s7 = scalar_lea.vmem %s1368_s23, 512  ;;  %s1155_s9 = smov [#allocation9]  }
  0x5e   : > { %822 = vmatprep.mubr.bf16.mxu0 %v941_v4  ;;  %826 = vmatprep.mubr.bf16.mxu1 %v943_v5  ;;  %v944_v11 = vld [vmem:[%s1347_s6 + $0x18] sm:$0xff]   ;;  %p1004_p6 = scmp.ne.s32.totalorder %s1368_s23, %s1003_s7  ;;  %s1007_s11 = sshll.u32 %s1155_s9, 4  ;;  %s1008_s11 = int_to_ptr.vmem [resolvable:$false] %s1007_s11 }
  0x5f   : > { %s1009_s5 = scalar_lea.vmem %s1008_s11, 1024  ;;  %p1010_p11 = scmp.lt.s32.totalorder %s1368_s23, %s1008_s11 }
  0x60   : > { %809 = vmatpush3.bf16.msra.mxu0 %v934_v1  ;;  %839 = vmatpush3.bf16.msra.mxu1 %v934_v1  ;;  %p1005_p8 = pnand %p1004_p6, %p1282_p10  ;;  %p1011_p0 = scmp.lt.s32.totalorder %s1009_s5, %s1003_s7 }
  0x61   : > { %810 = vmatprep.subr.bf16.mxu0 %v935_v2  ;;  %832 = vmatprep.subr.bf16.mxu1 %v935_v2 }
  0x62   : > { %p1006_p12 = pneg %p1005_p8  ;;  %p1012_p5 = por %p1011_p0, %p1010_p11 }
  0x64   : > { %811 = vmatpush3.bf16.msra.mxu0 %v935_v2  ;;  %840 = vmatpush3.bf16.msra.mxu1 %v935_v2  ;;  %p1013_p9 = pnand %p1012_p5, %p1006_p12 }
  0x65   : > { %812 = vmatprep.subr.bf16.mxu0 %v936_v3  ;;  %833 = vmatprep.subr.bf16.mxu1 %v936_v3 }
  0x68   : > { %813 = vmatpush3.bf16.msra.mxu0 %v936_v3  ;;  %841 = vmatpush3.bf16.msra.mxu1 %v936_v3 }
  0x69   : > { %814 = vmatprep.subr.bf16.mxu0 %v937_v6  ;;  %834 = vmatprep.subr.bf16.mxu1 %v937_v6 }
  0x6c   : > { %815 = vmatpush3.bf16.msra.mxu0 %v937_v6  ;;  %842 = vmatpush3.bf16.msra.mxu1 %v937_v6 }
  0x6d   : > { %816 = vmatprep.subr.bf16.mxu0 %v938_v7  ;;  %835 = vmatprep.subr.bf16.mxu1 %v938_v7 }
  0x70   : > { %817 = vmatpush3.bf16.msra.mxu0 %v938_v7  ;;  %843 = vmatpush3.bf16.msra.mxu1 %v938_v7 }
  0x71   : > { %818 = vmatprep.subr.bf16.mxu0 %v939_v8  ;;  %836 = vmatprep.subr.bf16.mxu1 %v939_v8 }
  0x74   : > { %819 = vmatpush3.bf16.msra.mxu0 %v939_v8  ;;  %844 = vmatpush3.bf16.msra.mxu1 %v939_v8 }
  0x75   : > { %820 = vmatprep.subr.bf16.mxu0 %v940_v9  ;;  %837 = vmatprep.subr.bf16.mxu1 %v940_v9 }
  0x78   : > { %821 = vmatpush3.bf16.msra.mxu0 %v940_v9  ;;  %845 = vmatpush3.bf16.msra.mxu1 %v940_v9 }
  0x7b   : > { %823 = vmatmul.mubr.bf16.vlgmr.msra.gmra.mrb[0].mxu0 %v942_v10  ;;  %827 = vmatmul.mubr.bf16.vlgmr.msra.gmra.mrb[0].mxu1 %v944_v11 }
 0x14e   : > { %v824_v12 = vpop.f32.mrb[0].mxu0  ;;  %v1363_v13 = vpop.f32.mrb[0].mxu1 }
 0x14f   : > { %v407_v14 = vpop.f32.mrb[1].mxu0  ;;  %v423_v15 = vpop.f32.mrb[1].mxu1  ;;  %v451_v27 = vmul.f32 %v824_v12, %v824_v12 }
 0x150   : > { %v825_v16 = vpop.f32.mrb[2].mxu0  ;;  %v1366_v17 = vpop.f32.mrb[2].mxu1  ;;  %v449_v22 = vmul.f32 %v407_v14, %v407_v14  ;;  %v453_v33 = vmul.f32 %v423_v15, %v423_v15 }
 0x151   : > { %v779_v18 = vpack.c.bf16 %v825_v16, %v824_v12  ;;  %v410_v19 = vpop.f32.mrb[3].mxu0  ;;  %v789_v20 = vpack.c.bf16 %v1366_v17, %v1363_v13  ;;  %v426_v21 = vpop.f32.mrb[3].mxu1  ;;  %v452_v30 = vmul.f32 %v825_v16, %v825_v16 }
 0x152   : > { %v439_v23 = vadd.f32 %v410_v19, %v407_v14  ;;  %v450_v24 = vmul.f32 %v410_v19, %v410_v19  ;;  %v774_v25 = vpack.c.bf16 %v410_v19, %v407_v14  ;;  %v784_v26 = vpack.c.bf16 %v426_v21, %v423_v15 }
 0x153   : > { %791 = vst [vmem:[%s251_s22 + $0x8] sm:$0xff] %v779_v18   ;;  %793 = vst [vmem:[%s251_s22 + $0x18] sm:$0xff] %v789_v20  }
 0x154   : > { %v440_v28 = vadd.f32 %v824_v12, %v439_v23  ;;  %v457_v29 = vadd.f32 %v450_v24, %v449_v22  ;;  %775 = vst [vmem:[%s251_s22] sm:$0xff] %v774_v25   ;;  %792 = vst [vmem:[%s251_s22 + $0x10] sm:$0xff] %v784_v26  }
 0x156   : > { %v458_v31 = vadd.f32 %v457_v29, %v451_v27  ;;  %v441_v32 = vadd.f32 %v825_v16, %v440_v28 }
 0x157   : > { %1016 = shalt.err (!%p1013_p9)
}
 0x158   : > { %s1017_s26 = scalar_lea.hbm %s1375_s14, 512  ;;  %s1021_s25 = scalar_lea.hbm %s1505_s2, 1024 }
 0x159   : > { %p1018_p1 = scmp.ne.s32.totalorder %s1375_s14, %s1017_s26  ;;  %p1022_p7 = scmp.lt.u32.totalorder %s1375_s14, %s1505_s2 }
 0x15a   : > { %p1023_p13 = scmp.lt.u32.totalorder %s1021_s25, %s1017_s26  ;;  %p1025_p6 = scmp.lt.u32.totalorder %s1017_s26, %s1375_s14 }
 0x15b   : > { %p1019_p2 = pnand %p1018_p1, %p1282_p10 }
 0x15c   : > { %p1024_p4 = por %p1023_p13, %p1022_p7 }
 0x15d   : > { %p1020_p3 = pneg %p1019_p2 }
 0x15e   : > { %p1026_p8 = por %p1025_p6, %p1024_p4 }
 0x160   : > { %p1027_p12 = pnand %p1026_p8, %p1020_p3 }
 0x162   : > { %1030 = shalt.err (!%p1027_p12)
}
 0x163   : > { %s1156_s7 = smov 64   ;;  %s1157_s9 = smov 4   ;;  %v442_v34 = vadd.f32 %v441_v32, %v423_v15  ;;  %v459_v35 = vadd.f32 %v458_v31, %v452_v30  ;;  %v454_v38 = vmul.f32 %v426_v21, %v426_v21  ;;  %v455_v39 = vmul.f32 %v1363_v13, %v1363_v13 }
 0x164   : > { %852 = dma.vmem_to_hbm [thread:$0]  (%p1282_p10), %s1368_s23, 512, %s1375_s14, %s514_s27, %s1156_s7, %s1156_s7, %s1157_s9   ;;  %v456_v42 = vmul.f32 %v1366_v17, %v1366_v17 }
 0x165   : > { %v460_v36 = vadd.f32 %v459_v35, %v453_v33  ;;  %v443_v37 = vadd.f32 %v442_v34, %v426_v21  ;;  %s518_s11 = sand.u32 1, %s1216_s21   ;;  %s757_s5 = sshll.u32 %s1141_s18, 7 }
 0x166   : > { %s258_s26 = scalar_lea.vmem [#allocation10], %s730_s30  ;;  %s1411_s22 = scalar_lea.vmem [#allocation12], %s730_s30 }
 0x167   : > { %s554_s6 = sshll.u32 %s258_s26, 4  ;;  %v444_v40 = vadd.f32 %v1363_v13, %v443_v37  ;;  %v461_v41 = vadd.f32 %v460_v36, %v454_v38  ;;  %s567_s23 = sshll.u32 %s1411_s22, 4  ;;  %s1422_s6 = int_to_ptr.vmem [resolvable:$true] %s554_s6  ;;  %s1429_s23 = int_to_ptr.vmem [resolvable:$true] %s567_s23 }
 0x168   : > { %s1420_s14 = scalar_lea.hbm %s1506_s3, %s757_s5  ;;  %s1427_s27 = scalar_lea.hbm %s1507_s4, %s757_s5 }
 0x169   : > { %v445_v43 = vadd.f32 %v1366_v17, %v444_v40  ;;  %v462_v44 = vadd.f32 %v461_v41, %v455_v39  ;;  %s1431_s25 = scalar_lea.sflag [#allocation11], %s518_s11  ;;  %s1031_s12 = scalar_lea.vmem %s1422_s6, 128 }
 0x16a   : > { %p1032_p11 = scmp.ne.s32.totalorder %s1422_s6, %s1031_s12  ;;  %s1158_s13 = smov [#allocation10]  }
 0x16b   : > { %v463_v45 = vadd.f32 %v462_v44, %v456_v42  ;;  %510 = vst [vmem:[%s258_s26] sm:$0xff] %v445_v43  ;;  %s1035_s7 = sshll.u32 %s1158_s13, 4  ;;  %s1036_s7 = int_to_ptr.vmem [resolvable:$false] %s1035_s7 }
 0x16c   : > { %p1033_p0 = pnand %p1032_p11, %p1282_p10  ;;  %s1037_s9 = scalar_lea.vmem %s1036_s7, 256 }
 0x16d   : > { %p1038_p9 = scmp.lt.s32.totalorder %s1422_s6, %s1036_s7  ;;  %p1039_p1 = scmp.lt.s32.totalorder %s1037_s9, %s1031_s12 }
 0x16e   : > { %p1034_p5 = pneg %p1033_p0 }
 0x16f   : > { %p1040_p2 = por %p1039_p1, %p1038_p9 }
 0x171   : > { %p1041_p3 = pnand %p1040_p2, %p1034_p5 }
 0x173   : > { %1044 = shalt.err (!%p1041_p3)
}
 0x174   : > { %s1045_s11 = scalar_lea.hbm %s1420_s14, 128  ;;  %s1049_s18 = scalar_lea.hbm %s1506_s3, 256 }
 0x175   : > { %p1046_p7 = scmp.ne.s32.totalorder %s1420_s14, %s1045_s11  ;;  %p1050_p6 = scmp.lt.u32.totalorder %s1420_s14, %s1506_s3 }
 0x176   : > { %p1051_p8 = scmp.lt.u32.totalorder %s1049_s18, %s1045_s11  ;;  %p1053_p11 = scmp.lt.u32.totalorder %s1045_s11, %s1420_s14 }
 0x177   : > { %p1047_p13 = pnand %p1046_p7, %p1282_p10 }
 0x178   : > { %p1052_p12 = por %p1051_p8, %p1050_p6 }
 0x179   : > { %p1048_p4 = pneg %p1047_p13 }
 0x17a   : > { %p1054_p0 = por %p1053_p11, %p1052_p12 }
 0x17c   : > { %p1055_p5 = pnand %p1054_p0, %p1048_p4 }
 0x17e   : > { %1058 = shalt.err (!%p1055_p5)
}
 0x17f   : > { %853 = dma.vmem_to_hbm [thread:$0]  (%p1282_p10), %s1422_s6, 128, %s1420_s14, %s1431_s25   ;;  %512 = vst [vmem:[%s1411_s22] sm:$0xff] %v463_v45 }
 0x180   : > { %s1059_s30 = scalar_lea.vmem %s1429_s23, 128  ;;  %s1159_s12 = smov [#allocation12]  }
 0x181   : > { %p1060_p9 = scmp.ne.s32.totalorder %s1429_s23, %s1059_s30  ;;  %s1063_s13 = sshll.u32 %s1159_s12, 4  ;;  %s1064_s13 = int_to_ptr.vmem [resolvable:$false] %s1063_s13 }
 0x182   : > { %s1065_s7 = scalar_lea.vmem %s1064_s13, 256  ;;  %p1066_p3 = scmp.lt.s32.totalorder %s1429_s23, %s1064_s13 }
 0x183   : > { %p1061_p1 = pnand %p1060_p9, %p1282_p10  ;;  %p1067_p7 = scmp.lt.s32.totalorder %s1065_s7, %s1059_s30 }
 0x185   : > { %p1062_p2 = pneg %p1061_p1  ;;  %p1068_p13 = por %p1067_p7, %p1066_p3 }
 0x187   : > { %p1069_p4 = pnand %p1068_p13, %p1062_p2 }
 0x189   : > { %1072 = shalt.err (!%p1069_p4)
}
 0x18a   : > { %s1073_s6 = scalar_lea.hbm %s1427_s27, 128  ;;  %s1077_s9 = scalar_lea.hbm %s1507_s4, 256 }
 0x18b   : > { %p1074_p6 = scmp.ne.s32.totalorder %s1427_s27, %s1073_s6  ;;  %p1078_p11 = scmp.lt.u32.totalorder %s1427_s27, %s1507_s4 }
 0x18c   : > { %p1079_p0 = scmp.lt.u32.totalorder %s1077_s9, %s1073_s6  ;;  %p1081_p9 = scmp.lt.u32.totalorder %s1073_s6, %s1427_s27 }
 0x18d   : > { %p1075_p8 = pnand %p1074_p6, %p1282_p10 }
 0x18e   : > { %p1080_p5 = por %p1079_p0, %p1078_p11 }
 0x18f   : > { %p1076_p12 = pneg %p1075_p8 }
 0x190   : > { %p1082_p1 = por %p1081_p9, %p1080_p5 }
 0x192   : > { %p1083_p2 = pnand %p1082_p1, %p1076_p12 }
 0x194   : > { %1086 = shalt.err (!%p1083_p2)
}
 0x195   : > { %854 = dma.vmem_to_hbm [thread:$0]  (%p1282_p10), %s1429_s23, 128, %s1427_s27, %s1431_s25  }
 0x196 PF: > { %s579_s26 = sand.u32 1, %s1129_s15   ;;  %p1524_p3 = scmp.ne.s32.totalorder %s1513_s24, 0 }
 0x197   : > { %p1525_p7 = scmp.ge.s32.totalorder %s1149_s20, 2  ;;  %s580_s18 = scalar_lea.sflag [#allocation6], %s579_s26 }
 0x199   : > { %p867_p13 = pnand %p1525_p7, %p1524_p3 }
 0x19b   : > { %1120 = dma.done.wait (!%p867_p13), %s580_s18, 512  }
 0x19c   : > { %1122 = vsyncadd (!%p867_p13), %s580_s18, 4294966784  ;;  %s1526_s21 = sadd.s32 4294967294, %s1149_s20  }
 0x19d   : > { %s588_s10 = sand.u32 1, %s1526_s21  }
 0x19e   : > { %s589_s30 = scalar_lea.sflag [#allocation11], %s588_s10 }
 0x19f   : > { %1124 = dma.done.wait (!%p867_p13), %s589_s30, 256  }
 0x1a0   : > { %1126 = vsyncadd (!%p867_p13), %s589_s30, 4294967040  ;;  %s25_s20 = sadd.s32 1, %s1149_s20   ;;  %s1527_s15 = smov %s1133_s16 }
 0x1a1   : > { %p22_p10 = scmp.ge.s32.totalorder %s25_s20, 4   ;;  %s1528_s16 = smov %s1137_s17 }
 0x1a2   : > { %s1529_s17 = smov %s1291_s8  ;;  %s1530_s18 = smov %s1145_s19 }
 0x1a3   : > { %s1531_s19 = smov %s1533_s29  ;;  %24 = sbr.rel (!%p22_p10) target bundleno = 9 (0x9), region = 117 }
 0x1aa   :  { %603 = vsyncpa [#allocation5], 1 }
 0x1ab   :  { %605 = vsyncpa [#allocation5 + $0x1], 1 }
 0x1ac   :  { %606 = vsyncpa [#allocation8], 1 }
 0x1ad   :  { %607 = vsyncpa [#allocation6], 1 }
 0x1ae   :  { %609 = vsyncpa [#allocation6 + $0x1], 1 }
 0x1af   :  { %610 = vsyncpa [#allocation11], 1 }
 0x1b0   :  { %612 = vsyncpa [#allocation11 + $0x1], 1 }

</bundles_post_ra>
